<compile_context>
chip_gen: v7x
topology: tpu7x:2x2x1
jax: 0.10.0
libtpu: 0.0.40
codegen_flags: <defaults>
</compile_context>

<pallas_src>
import jax
import jax.numpy as jnp
import numpy as np
from jax.experimental import pallas as pl
from jax.experimental.pallas import tpu as pltpu

H, W = 28, 28      # input spatial
KH, KW = 20, 20    # conv kernel
OH, OW = 9, 9      # conv output spatial (28 - 20 + 1)
NCLS = 10
NFEAT = H * W      # 784


# ----------------------------------------------------------------------------
# Kernel
# ----------------------------------------------------------------------------
def mnist_kernel(x_ref, w_ref, b_ref, out_ref):
    # x_ref  : (B_TILE, 784) f32/bf16 VMEM -- flattened input images
    # w_ref  : (784, 10)     f32/bf16 VMEM -- folded conv+fc weight (resident)
    # b_ref  : (1, 10)       f32 VMEM      -- folded bias
    # out_ref: (B_TILE, 10)  f32 VMEM      -- log-probs
    logits = jnp.dot(x_ref[...], w_ref[...],
                     preferred_element_type=jnp.float32)   # f32 accumulate
    logits = logits + b_ref[...]

    # log_softmax along the 10-wide lane axis (all f32 on the VPU/EUP).
    m = jnp.max(logits, axis=1, keepdims=True)
    s = logits - m
    lse = jnp.log(jnp.sum(jnp.exp(s), axis=1, keepdims=True))
    out_ref[...] = s - lse


# ----------------------------------------------------------------------------
# One-time parameter fold (call ONCE at parameter-load time, not per forward)
# ----------------------------------------------------------------------------
def _im2col_matrix(conv_w):
    """Analytic (784, 81) im2col matrix of Conv2d(1,1,20,1): scatter conv_w."""
    w = conv_w.reshape(KH, KW).astype(jnp.float32)
    # Static index arrays: m[(oh+i)*W + (ow+j), oh*OW + ow] = w[i, j]
    oh = np.arange(OH)[:, None, None, None]
    ow = np.arange(OW)[None, :, None, None]
    ki = np.arange(KH)[None, None, :, None]
    kj = np.arange(KW)[None, None, None, :]
    p_idx = (oh + ki) * W + (ow + kj)                       # (OH, OW, KH, KW)
    k_idx = np.broadcast_to(oh * OW + ow, p_idx.shape)
    vals = jnp.broadcast_to(w[None, None, :, :], (OH, OW, KH, KW)).reshape(-1)
    m = jnp.zeros((NFEAT, OH * OW), jnp.float32)
    return m.at[p_idx.reshape(-1), k_idx.reshape(-1)].set(vals)


def fold_params(conv_w, conv_b, fc_w, fc_b, dtype=jnp.float32):
    """Fold Conv2d(1,1,20,1) + flatten + Linear(81,10) into (784,10) + (1,10).

    Call once when loading parameters; pass the results to mnist_forward().
    `dtype` may be jnp.bfloat16 to halve weight HBM traffic (bias stays f32).
    """
    m_conv = _im2col_matrix(conv_w)                              # (784, 81)
    fc_w32 = fc_w.astype(jnp.float32)
    w_eff = (m_conv @ fc_w32.T).astype(dtype)                    # (784, 10)
    b_eff = (conv_b.astype(jnp.float32)[0] * jnp.sum(fc_w32, axis=1)
             + fc_b.astype(jnp.float32)).reshape(1, NCLS)        # (1, 10) f32
    return w_eff, b_eff


# ----------------------------------------------------------------------------
# Forward (hot path): just one pallas_call on pre-folded parameters
# ----------------------------------------------------------------------------
def _pick_batch_tile(B, b_tile):
    """Big tile to amortize grid-step overhead, >=2 steps on large batches."""
    if B <= 8:
        return B
    bt = max(8, (min(b_tile, B) // 8) * 8)
    if pl.cdiv(B, bt) < 2:
        # Keep at least 2 grid steps so the "parallel" axis can feed both
        # TensorCores on v7x instead of leaving one idle.
        bt = max(8, ((pl.cdiv(B, 2) + 7) // 8) * 8)
    return bt


def mnist_forward(x, w_eff, b_eff, b_tile=4096):
    """x: (B, 1, 28, 28) f32 or bf16 NCHW. Returns (B, 10) f32 log-probs."""
    B = x.shape[0]
    xf = x.reshape(B, NFEAT)                      # no dtype cast (keep bf16 bf16)
    bt = _pick_batch_tile(B, b_tile)
    grid = (pl.cdiv(B, bt),)

    # Scoped-VMEM budget: double-buffered x + double-buffered (lane-padded)
    # output + resident weight.  Only raise the limit when we actually exceed
    # the most conservative default (v5e: 16 MiB); cap well under v7x's 64 MiB.
    itemsize = jnp.dtype(xf.dtype).itemsize
    need = (2 * bt * NFEAT * itemsize
            + 2 * bt * 128 * 4
            + NFEAT * 128 * 4
            + (1 << 20))
    cp_kwargs = dict(dimension_semantics=("parallel",))
    if need > 14 * (1 << 20):
        cp_kwargs["vmem_limit_bytes"] = min(int(need * 1.25), 56 * (1 << 20))

    return pl.pallas_call(
        mnist_kernel,
        out_shape=jax.ShapeDtypeStruct((B, NCLS), jnp.float32),
        grid_spec=pltpu.PrefetchScalarGridSpec(
            num_scalar_prefetch=0,
            grid=grid,
            in_specs=[
                pl.BlockSpec((bt, NFEAT), lambda b: (b, 0)),     # x tile
                pl.BlockSpec((NFEAT, NCLS), lambda b: (0, 0)),   # resident W_eff
                pl.BlockSpec((1, NCLS), lambda b: (0, 0)),       # resident bias
            ],
            out_specs=pl.BlockSpec((bt, NCLS), lambda b: (b, 0)),
        ),
        compiler_params=pltpu.CompilerParams(**cp_kwargs),
    )(xf, w_eff, b_eff)


# ----------------------------------------------------------------------------
# Pure-JAX reference (matches the PyTorch forward)
# ----------------------------------------------------------------------------
def reference(x, conv_w, conv_b, fc_w, fc_b):
    out = jax.lax.conv_general_dilated(
        x, conv_w, window_strides=(1, 1), padding="VALID",
        dimension_numbers=("NCHW", "OIHW", "NCHW"))
    out = out + conv_b.reshape(1, -1, 1, 1)
    flat = out.reshape(x.shape[0], -1)                 # (B, 81)
    logits = flat @ fc_w.T + fc_b
    return jax.nn.log_softmax(logits, axis=1)


if __name__ == "__main__":
    key = jax.random.PRNGKey(0)
    k1, k2, k3, k4, k5 = jax.random.split(key, 5)

    # Deterministic synthetic parameters (PyTorch-default-ish uniform init).
    conv_bound = 1.0 / np.sqrt(1 * KH * KW)
    fc_bound = 1.0 / np.sqrt(81)
    conv_w = jax.random.uniform(k1, (1, 1, KH, KW), jnp.float32,
                                -conv_bound, conv_bound)
    conv_b = jax.random.uniform(k2, (1,), jnp.float32, -conv_bound, conv_bound)
    fc_w = jax.random.uniform(k3, (NCLS, 81), jnp.float32, -fc_bound, fc_bound)
    fc_b = jax.random.uniform(k4, (NCLS,), jnp.float32, -fc_bound, fc_bound)

    # Small batch; spatial size is forced to 28x28 by the 20x20 conv + fc1(81).
    x = jax.random.normal(k5, (2, 1, H, W), jnp.float32)

    # Fold ONCE at parameter-load time (not in the per-call hot path).
    w_eff, b_eff = fold_params(conv_w, conv_b, fc_w, fc_b)
    w_eff, b_eff = jax.block_until_ready((w_eff, b_eff))

    out = mnist_forward(x, w_eff, b_eff)
    out = jax.block_until_ready(out)

    ref = jax.block_until_ready(reference(x, conv_w, conv_b, fc_w, fc_b))
    assert out.shape == (2, NCLS) and out.dtype == jnp.float32
    np.testing.assert_allclose(np.asarray(out), np.asarray(ref),
                               rtol=1e-4, atol=1e-4)
    print("KERNEL_OK")
</pallas_src>

<mosaic_0001>
module attributes {stable_mosaic.version = 11 : i64} {
  func.func @mnist_kernel(%arg0: i32, %arg1: memref<2x784xf32, #tpu.memory_space<vmem>>, %arg2: memref<784x10xf32, #tpu.memory_space<vmem>>, %arg3: memref<1x10xf32, #tpu.memory_space<vmem>>, %arg4: memref<2x10xf32, #tpu.memory_space<vmem>>) attributes {dimension_semantics = [#tpu.dimension_semantics<parallel>], iteration_bounds = array<i64: 1>, scalar_prefetch = 0 : i64, scratch_operands = 0 : i64, tpu.core_type = #tpu.core_type<tc>, window_params = [{transform_indices = @transform_0, window_bounds = array<i64: 2, 784>}, {pipeline_mode = #tpu.pipeline_mode<synchronous>, transform_indices = @transform_1, window_bounds = array<i64: 784, 10>}, {pipeline_mode = #tpu.pipeline_mode<synchronous>, transform_indices = @transform_2, window_bounds = array<i64: 1, 10>}, {transform_indices = @transform_3, window_bounds = array<i64: 2, 10>}]} {
    %c0 = arith.constant 0 : index
    %c0_0 = arith.constant 0 : index
    %0 = vector.load %arg1[%c0, %c0_0] : memref<2x784xf32, #tpu.memory_space<vmem>>, vector<2x784xf32>
    %c0_1 = arith.constant 0 : index
    %c0_2 = arith.constant 0 : index
    %1 = vector.load %arg2[%c0_1, %c0_2] : memref<784x10xf32, #tpu.memory_space<vmem>>, vector<784x10xf32>
    %cst = arith.constant dense<0.000000e+00> : vector<2x10xf32>
    %2 = tpu.matmul %0, %1, %cst {dimension_numbers = #tpu.dot_dimension_numbers<[1], [0], [0], [1], [0, 0, 1, 1], [], []>} : vector<2x784xf32>, vector<784x10xf32>, vector<2x10xf32> -> vector<2x10xf32>
    %c0_3 = arith.constant 0 : index
    %c0_4 = arith.constant 0 : index
    %3 = vector.load %arg3[%c0_3, %c0_4] : memref<1x10xf32, #tpu.memory_space<vmem>>, vector<1x10xf32>
    %4 = vector.broadcast %3 : vector<1x10xf32> to vector<2x10xf32>
    %5 = arith.addf %2, %4 : vector<2x10xf32>
    %cst_5 = arith.constant dense<0xFF800000> : vector<2xf32>
    %6 = vector.multi_reduction <maximumf>, %5, %cst_5 [1] : vector<2x10xf32> to vector<2xf32>
    %7 = vector.shape_cast %6 : vector<2xf32> to vector<2x1xf32>
    %8 = vector.broadcast %7 : vector<2x1xf32> to vector<2x10xf32>
    %9 = arith.subf %5, %8 : vector<2x10xf32>
    %10 = math.exp %9 : vector<2x10xf32>
    %cst_6 = arith.constant dense<0.000000e+00> : vector<2xf32>
    %11 = vector.multi_reduction <add>, %10, %cst_6 [1] : vector<2x10xf32> to vector<2xf32>
    %12 = vector.shape_cast %11 : vector<2xf32> to vector<2x1xf32>
    %13 = math.log %12 : vector<2x1xf32>
    %14 = vector.broadcast %13 : vector<2x1xf32> to vector<2x10xf32>
    %15 = arith.subf %9, %14 : vector<2x10xf32>
    %c0_7 = arith.constant 0 : index
    %c0_8 = arith.constant 0 : index
    %16 = vector.load %arg4[%c0_7, %c0_8] : memref<2x10xf32, #tpu.memory_space<vmem>>, vector<2x10xf32>
    tpu.vector_store %arg4[%c0_7, %c0_8], %15 {strides = array<i32>} : memref<2x10xf32, #tpu.memory_space<vmem>>, vector<2x10xf32>,
    return
  }
  func.func @transform_0(%arg0: i32) -> (i32, i32) {
    %c0_i32 = arith.constant 0 : i32
    %c0_i32_0 = arith.constant 0 : i32
    return %arg0, %c0_i32 : i32, i32
  }
  func.func @transform_1(%arg0: i32) -> (i32, i32) {
    %c0_i32 = arith.constant 0 : i32
    %c0_i32_0 = arith.constant 0 : i32
    %c0_i32_1 = arith.constant 0 : i32
    return %c0_i32, %c0_i32_0 : i32, i32
  }
  func.func @transform_2(%arg0: i32) -> (i32, i32) {
    %c0_i32 = arith.constant 0 : i32
    %c0_i32_0 = arith.constant 0 : i32
    %c0_i32_1 = arith.constant 0 : i32
    return %c0_i32, %c0_i32_0 : i32, i32
  }
  func.func @transform_3(%arg0: i32) -> (i32, i32) {
    %c0_i32 = arith.constant 0 : i32
    %c0_i32_0 = arith.constant 0 : i32
    return %arg0, %c0_i32 : i32, i32
  }
}

</mosaic_0001>

<bundles_post_ra>
// kernel: tpu_custom_call.1
= control target key start
LH: loop header
LB: loop body
LE: loop exit
PB: predicated region body
PF: predicated region fallthrough
CT: control target
= control target key end

     0   :  { %v725_v43 = vmov 1983009808   ;;  %v128_v45 = vlaneseq  ;;  %s1079_s0 = inlined_call_operand.vmem [shape: f32[2,784], index: 0, kind: input, shape index: {}]   ;;  %s1080_s1 = inlined_call_operand.vmem [shape: f32[784,10], index: 1, kind: input, shape index: {}]   ;;  %s1081_s2 = inlined_call_operand.vmem [shape: f32[1,10], index: 2, kind: input, shape index: {}]   ;;  %s1082_s3 = inlined_call_operand.hbm [shape: f32[2,10], index: 3, kind: output, shape index: {}]  }
   0x1   :  { %v33_v0 = vld [vmem:[%s1080_s1 + $0x80] sm:$0xff]  ;;  %v34_v1 = vld [vmem:[%s1080_s1 + $0x88] sm:$0xff]  ;;  %v35_v11 = vld [vmem:[%s1080_s1 + $0x90] sm:$0xff]  ;;  %v126_v44 = vunpack.c.l.s4 %v725_v43 }
   0x2   :  { %v17_v2 = vld [vmem:[%s1080_s1] sm:$0xff]  ;;  %v591_v3 = vpack.c.bf16 %v34_v1, %v33_v0  ;;  %v18_v4 = vld [vmem:[%s1080_s1 + $0x8] sm:$0xff]  ;;  %v36_v13 = vld [vmem:[%s1080_s1 + $0x98] sm:$0xff]  ;;  %v129_v60 = vshrl.u32 %v128_v45, 7 }
   0x3   :  { %v65_v5 = vld [vmem:[%s1080_s1 + $0x180] sm:$0xff]  ;;  %v66_v6 = vld [vmem:[%s1080_s1 + $0x188] sm:$0xff]  ;;  %v593_v7 = vpack.c.bf16 %v18_v4, %v17_v2  ;;  %v19_v14 = vld [vmem:[%s1080_s1 + $0x10] sm:$0xff]  ;;  %v595_v16 = vpack.c.bf16 %v36_v13, %v35_v11  ;;  %v127_v59 = vunpack.c.0.s8 %v126_v44 }
   0x4   :  { %v623_v8 = vpack.c.bf16 %v66_v6, %v65_v5  ;;  %v49_v9 = vld [vmem:[%s1080_s1 + $0x100] sm:$0xff]  ;;  %v50_v10 = vld [vmem:[%s1080_s1 + $0x108] sm:$0xff]  ;;  %592 = vmatprep.subr.bf16.mxu0 %v591_v3  ;;  %v20_v15 = vld [vmem:[%s1080_s1 + $0x18] sm:$0xff] }
   0x5   :  { %v625_v12 = vpack.c.bf16 %v50_v10, %v49_v9  ;;  %594 = vmatpush3.bf16.msra.mxu0 %v593_v7  ;;  %v597_v17 = vpack.c.bf16 %v20_v15, %v19_v14  ;;  %v67_v18 = vld [vmem:[%s1080_s1 + $0x190] sm:$0xff]  ;;  %v68_v19 = vld [vmem:[%s1080_s1 + $0x198] sm:$0xff]  ;;  %v37_v23 = vld [vmem:[%s1080_s1 + $0xa0] sm:$0xff]  ;;  %v894_v10 = vsub.s32 %v127_v59, %v129_v60 }
   0x6   :  { %624 = vmatprep.subr.bf16.mxu1 %v623_v8  ;;  %v51_v20 = vld [vmem:[%s1080_s1 + $0x110] sm:$0xff]  ;;  %v627_v21 = vpack.c.bf16 %v68_v19, %v67_v18  ;;  %v52_v22 = vld [vmem:[%s1080_s1 + $0x118] sm:$0xff]  ;;  %v38_v24 = vld [vmem:[%s1080_s1 + $0xa8] sm:$0xff]  ;;  %596 = vmatprep.subr.bf16.mxu0 %v595_v16 }
   0x7   :  { %626 = vmatpush3.bf16.msra.mxu1 %v625_v12  ;;  %v629_v25 = vpack.c.bf16 %v52_v22, %v51_v20  ;;  %v599_v26 = vpack.c.bf16 %v38_v24, %v37_v23  ;;  %v21_v27 = vld [vmem:[%s1080_s1 + $0x20] sm:$0xff]  ;;  %v22_v28 = vld [vmem:[%s1080_s1 + $0x28] sm:$0xff]  ;;  %v39_v35 = vld [vmem:[%s1080_s1 + $0xb0] sm:$0xff] }
   0x8   :  { %v69_v29 = vld [vmem:[%s1080_s1 + $0x1a0] sm:$0xff]  ;;  %628 = vmatprep.subr.bf16.mxu1 %v627_v21  ;;  %v70_v30 = vld [vmem:[%s1080_s1 + $0x1a8] sm:$0xff]  ;;  %v601_v33 = vpack.c.bf16 %v22_v28, %v21_v27  ;;  %v40_v36 = vld [vmem:[%s1080_s1 + $0xb8] sm:$0xff] }
   0x9   :  { %v53_v31 = vld [vmem:[%s1080_s1 + $0x120] sm:$0xff]  ;;  %v54_v32 = vld [vmem:[%s1080_s1 + $0x128] sm:$0xff]  ;;  %598 = vmatpush3.bf16.msra.mxu0 %v597_v17  ;;  %v631_v34 = vpack.c.bf16 %v70_v30, %v69_v29  ;;  %v23_v37 = vld [vmem:[%s1080_s1 + $0x30] sm:$0xff]  ;;  %v603_v39 = vpack.c.bf16 %v40_v36, %v39_v35 }
   0xa   :  { %600 = vmatprep.subr.bf16.mxu0 %v599_v26  ;;  %v633_v38 = vpack.c.bf16 %v54_v32, %v53_v31  ;;  %v24_v40 = vld [vmem:[%s1080_s1 + $0x38] sm:$0xff]  ;;  %v71_v41 = vld [vmem:[%s1080_s1 + $0x1b0] sm:$0xff]  ;;  %v41_v49 = vld [vmem:[%s1080_s1 + $0xc0] sm:$0xff] }
   0xb   :  { %630 = vmatpush3.bf16.msra.mxu1 %v629_v25  ;;  %v72_v42 = vld [vmem:[%s1080_s1 + $0x1b8] sm:$0xff]  ;;  %v55_v47 = vld [vmem:[%s1080_s1 + $0x130] sm:$0xff]  ;;  %v42_v50 = vld [vmem:[%s1080_s1 + $0xc8] sm:$0xff]  ;;  %v605_v51 = vpack.c.bf16 %v24_v40, %v23_v37 }
   0xc   :  { %632 = vmatprep.subr.bf16.mxu1 %v631_v34  ;;  %v635_v46 = vpack.c.bf16 %v72_v42, %v71_v41  ;;  %v56_v48 = vld [vmem:[%s1080_s1 + $0x138] sm:$0xff]  ;;  %v73_v52 = vld [vmem:[%s1080_s1 + $0x1c0] sm:$0xff]  ;;  %v74_v53 = vld [vmem:[%s1080_s1 + $0x1c8] sm:$0xff]  ;;  %v607_v55 = vpack.c.bf16 %v42_v50, %v41_v49 }
   0xd   :  { %602 = vmatpush3.bf16.msra.mxu0 %v601_v33  ;;  %v637_v54 = vpack.c.bf16 %v56_v48, %v55_v47  ;;  %v25_v56 = vld [vmem:[%s1080_s1 + $0x40] sm:$0xff]  ;;  %v26_v57 = vld [vmem:[%s1080_s1 + $0x48] sm:$0xff]  ;;  %v639_v61 = vpack.c.bf16 %v74_v53, %v73_v52  ;;  %v43_v63 = vld [vmem:[%s1080_s1 + $0xd0] sm:$0xff] }
   0xe   :  { %604 = vmatprep.subr.bf16.mxu0 %v603_v39  ;;  %v57_v58 = vld [vmem:[%s1080_s1 + $0x140] sm:$0xff]  ;;  %v58_v62 = vld [vmem:[%s1080_s1 + $0x148] sm:$0xff]  ;;  %v44_v0 = vld [vmem:[%s1080_s1 + $0xd8] sm:$0xff]  ;;  %v609_v3 = vpack.c.bf16 %v26_v57, %v25_v56 }
   0xf   :  { %634 = vmatpush3.bf16.msra.mxu1 %v633_v38  ;;  %v75_v1 = vld [vmem:[%s1080_s1 + $0x1d0] sm:$0xff]  ;;  %v76_v2 = vld [vmem:[%s1080_s1 + $0x1d8] sm:$0xff]  ;;  %v641_v5 = vpack.c.bf16 %v58_v62, %v57_v58  ;;  %v611_v6 = vpack.c.bf16 %v44_v0, %v43_v63  ;;  %v45_v12 = vld [vmem:[%s1080_s1 + $0xe0] sm:$0xff] }
  0x10   :  { %636 = vmatprep.subr.bf16.mxu1 %v635_v46  ;;  %v27_v4 = vld [vmem:[%s1080_s1 + $0x50] sm:$0xff]  ;;  %v28_v7 = vld [vmem:[%s1080_s1 + $0x58] sm:$0xff]  ;;  %v643_v11 = vpack.c.bf16 %v76_v2, %v75_v1  ;;  %v46_v13 = vld [vmem:[%s1080_s1 + $0xe8] sm:$0xff] }
  0x11   :  { %606 = vmatpush3.bf16.msra.mxu0 %v605_v51  ;;  %v59_v8 = vld [vmem:[%s1080_s1 + $0x150] sm:$0xff]  ;;  %v60_v9 = vld [vmem:[%s1080_s1 + $0x158] sm:$0xff]  ;;  %v77_v14 = vld [vmem:[%s1080_s1 + $0x1e0] sm:$0xff]  ;;  %v613_v16 = vpack.c.bf16 %v28_v7, %v27_v4  ;;  %v615_v19 = vpack.c.bf16 %v46_v13, %v45_v12 }
  0x12   :  { %608 = vmatprep.subr.bf16.mxu0 %v607_v55  ;;  %v78_v15 = vld [vmem:[%s1080_s1 + $0x1e8] sm:$0xff]  ;;  %v645_v17 = vpack.c.bf16 %v60_v9, %v59_v8  ;;  %v15_v18 = vld [vmem:[%s1079_s0] sm:$0xff]  ;;  %v47_v27 = vld [vmem:[%s1080_s1 + $0xf0] sm:$0xff] }
  0x13   :  { %638 = vmatpush3.bf16.msra.mxu1 %v637_v54  ;;  %v29_v20 = vld [vmem:[%s1080_s1 + $0x60] sm:$0xff]  ;;  %v30_v21 = vld [vmem:[%s1080_s1 + $0x68] sm:$0xff]  ;;  %v131_v23 = vrot.slane %v15_v18, %v894_v10  ;;  %v124_v24 = vcombine.high %v15_v18, %v15_v18  ;;  %v647_v25 = vpack.c.bf16 %v78_v15, %v77_v14  ;;  %v48_v28 = vld [vmem:[%s1080_s1 + $0xf8] sm:$0xff] }
  0x14   :  { %640 = vmatprep.subr.bf16.mxu1 %v639_v61  ;;  %v61_v22 = vld [vmem:[%s1080_s1 + $0x160] sm:$0xff]  ;;  %v62_v26 = vld [vmem:[%s1080_s1 + $0x168] sm:$0xff]  ;;  %v79_v29 = vld [vmem:[%s1080_s1 + $0x1f0] sm:$0xff]  ;;  %v617_v33 = vpack.c.bf16 %v30_v21, %v29_v20  ;;  %v619_v35 = vpack.c.bf16 %v48_v28, %v47_v27 }
  0x15   :  { %610 = vmatpush3.bf16.msra.mxu0 %v609_v3  ;;  %v80_v30 = vld [vmem:[%s1080_s1 + $0x1f8] sm:$0xff]  ;;  %v139_v31 = vcombine.high %v131_v23, %v131_v23  ;;  %v138_v32 = vrot.slane %v124_v24, %v894_v10  ;;  %v649_v34 = vpack.c.bf16 %v62_v26, %v61_v22  ;;  %v31_v36 = vld [vmem:[%s1080_s1 + $0x70] sm:$0xff]  ;;  %v97_v42 = vld [vmem:[%s1080_s1 + $0x280] sm:$0xff] }
  0x16   :  { %612 = vmatprep.subr.bf16.mxu0 %v611_v6  ;;  %v32_v37 = vld [vmem:[%s1080_s1 + $0x78] sm:$0xff]  ;;  %v63_v38 = vld [vmem:[%s1080_s1 + $0x170] sm:$0xff]  ;;  %v651_v40 = vpack.c.bf16 %v80_v30, %v79_v29  ;;  %v98_v43 = vld [vmem:[%s1080_s1 + $0x288] sm:$0xff] }
  0x17   :  { %642 = vmatpush3.bf16.msra.mxu1 %v641_v5  ;;  %v140_v39 = vcombine.high %v138_v32, %v138_v32  ;;  %230 = vmatprep.mubr.f32.mxu0 %v139_v31  ;;  %v64_v41 = vld [vmem:[%s1080_s1 + $0x178] sm:$0xff]  ;;  %v621_v44 = vpack.c.bf16 %v32_v37, %v31_v36  ;;  %v655_v46 = vpack.c.bf16 %v98_v43, %v97_v42  ;;  %v81_v47 = vld [vmem:[%s1080_s1 + $0x200] sm:$0xff]  ;;  %v82_v48 = vld [vmem:[%s1080_s1 + $0x208] sm:$0xff] }
  0x18   :  { %644 = vmatprep.subr.bf16.mxu1 %v643_v11  ;;  %v653_v45 = vpack.c.bf16 %v64_v41, %v63_v38  ;;  %v99_v49 = vld [vmem:[%s1080_s1 + $0x290] sm:$0xff]  ;;  %v100_v50 = vld [vmem:[%s1080_s1 + $0x298] sm:$0xff]  ;;  %v657_v51 = vpack.c.bf16 %v82_v48, %v81_v47  ;;  %v16_v53 = vld [vmem:[%s1079_s0 + $0x8] sm:$0x3f] }
  0x19   :  { %614 = vmatpush3.bf16.msra.mxu0 %v613_v16  ;;  %300 = vmatprep.mubr.f32.mxu1 %v140_v39  ;;  %v83_v52 = vld [vmem:[%s1080_s1 + $0x210] sm:$0xff]  ;;  %v113_v54 = vld [vmem:[%s1080_s1 + $0x300] sm:$0xff]  ;;  %v659_v55 = vpack.c.bf16 %v100_v50, %v99_v49  ;;  %v84_v56 = vld [vmem:[%s1080_s1 + $0x218] sm:$0xff]  ;;  %v141_v57 = vcombine.high %v16_v53, %v16_v53  ;;  %v980_v58 = vrot.slane %v16_v53, %v894_v10 }
  0x1a   :  { %616 = vmatprep.subr.bf16.mxu0 %v615_v19  ;;  %v114_v59 = vld [vmem:[%s1080_s1 + $0x308] sm:$0xff] }
  0x1b   :  { %646 = vmatpush3.bf16.msra.mxu1 %v645_v17 }
  0x1c   :  { %648 = vmatprep.subr.bf16.mxu1 %v647_v25 }
  0x1d   :  { %618 = vmatpush3.bf16.msra.mxu0 %v617_v33 }
  0x1e   :  { %620 = vmatprep.subr.bf16.mxu0 %v619_v35 }
  0x1f   :  { %650 = vmatpush3.bf16.msra.mxu1 %v649_v34 }
  0x20   :  { %652 = vmatprep.subr.bf16.mxu1 %v651_v40 }
  0x21   :  { %622 = vmatpush3.bf16.msra.mxu0 %v621_v44 }
  0x22   :  { %656 = vmatprep.subr.bf16.mxu0 %v655_v46 }
  0x23   :  { %654 = vmatpush3.bf16.msra.mxu1 %v653_v45 }
  0x24   :  { %8 = vsyncpa [#allocation3], 0  ;;  %v101_v60 = vld [vmem:[%s1080_s1 + $0x2a0] sm:$0xff]  ;;  %v102_v61 = vld [vmem:[%s1080_s1 + $0x2a8] sm:$0xff]  ;;  %v726_v62 = vmov 0.0|0.0   ;;  %v688_v63 = vpack.c.bf16 %v114_v59, %v113_v54  ;;  %231 = vmatmul.mubr.f32.vlgmr.msra.gmra.mrb[0].mxu0 %v131_v23  ;;  %v156_v0 = vcombine.high %v980_v58, %v980_v58  ;;  %v661_v1 = vpack.c.bf16 %v84_v56, %v83_v52 }
  0x25   :  { %687 = vmatprep.subr.bf16.mxu1 %v726_v62  ;;  %658 = vmatpush3.bf16.msra.mxu0 %v657_v51  ;;  %v663_v2 = vpack.c.bf16 %v102_v61, %v101_v60  ;;  %v85_v3 = vld [vmem:[%s1080_s1 + $0x220] sm:$0xff]  ;;  %v86_v4 = vld [vmem:[%s1080_s1 + $0x228] sm:$0xff]  ;;  %v155_v5 = vrot.slane %v141_v57, %v894_v10  ;;  %v103_v6 = vld [vmem:[%s1080_s1 + $0x2b0] sm:$0xff]  ;;  %vm727_vm0 = vmmov 0   ;;  %v728_v8 = vmov 0.0  }
  0x26   :  { %301 = vmatmul.mubr.f32.vlgmr.msra.gmra.mrb[0].mxu1 %v138_v32  ;;  %660 = vmatprep.subr.bf16.mxu0 %v659_v55  ;;  %v104_v7 = vld [vmem:[%s1080_s1 + $0x2b8] sm:$0xff]  ;;  %vm163_vm1 = vcmask 130048   ;;  %v665_v9 = vpack.c.bf16 %v86_v4, %v85_v3  ;;  %v87_v10 = vld [vmem:[%s1080_s1 + $0x230] sm:$0xff]  ;;  %v105_v13 = vld [vmem:[%s1080_s1 + $0x2c0] sm:$0xff]  ;;  %vm446_vm2 = vcmask 74752  }
  0x27   :  { %370 = vmatprep.mubr.f32.mxu0 %v156_v0  ;;  %689 = vmatpush3.bf16.msra.mxu1 %v688_v63  ;;  %v667_v11 = vpack.c.bf16 %v104_v7, %v103_v6  ;;  %v88_v12 = vld [vmem:[%s1080_s1 + $0x238] sm:$0xff]  ;;  %v106_v14 = vld [vmem:[%s1080_s1 + $0x2c8] sm:$0xff]  ;;  %v89_v17 = vld [vmem:[%s1080_s1 + $0x240] sm:$0xff] }
  0x28   :  { %588 = vmatprep.mubr.msk.f32.mxu1 %vm727_vm0, %v728_v8  ;;  %v669_v15 = vpack.c.bf16 %v88_v12, %v87_v10  ;;  %v671_v16 = vpack.c.bf16 %v106_v14, %v105_v13  ;;  %v90_v18 = vld [vmem:[%s1080_s1 + $0x248] sm:$0xff]  ;;  %v107_v19 = vld [vmem:[%s1080_s1 + $0x2d0] sm:$0xff]  ;;  %v108_v20 = vld [vmem:[%s1080_s1 + $0x2d8] sm:$0xff] }
  0x29   :  { %662 = vmatpush3.bf16.msra.mxu0 %v661_v1  ;;  %v673_v21 = vpack.c.bf16 %v90_v18, %v89_v17  ;;  %v675_v22 = vpack.c.bf16 %v108_v20, %v107_v19  ;;  %v91_v23 = vld [vmem:[%s1080_s1 + $0x250] sm:$0xff]  ;;  %v92_v24 = vld [vmem:[%s1080_s1 + $0x258] sm:$0xff]  ;;  %v109_v25 = vld [vmem:[%s1080_s1 + $0x2e0] sm:$0xff] }
  0x2a   :  { %664 = vmatprep.subr.bf16.mxu0 %v663_v2  ;;  %589 = vmatmul.mubr.msk.f32.vlgmr.msra.gmra.mrb[2].mxu1 %vm163_vm1, %v155_v5  ;;  %v110_v26 = vld [vmem:[%s1080_s1 + $0x2e8] sm:$0xff]  ;;  %v677_v27 = vpack.c.bf16 %v92_v24, %v91_v23  ;;  %v93_v29 = vld [vmem:[%s1080_s1 + $0x260] sm:$0xff]  ;;  %v111_v31 = vld [vmem:[%s1080_s1 + $0x2f0] sm:$0xff] }
  0x2b   :  { %v679_v28 = vpack.c.bf16 %v110_v26, %v109_v25  ;;  %v94_v30 = vld [vmem:[%s1080_s1 + $0x268] sm:$0xff]  ;;  %v112_v32 = vld [vmem:[%s1080_s1 + $0x2f8] sm:$0xff]  ;;  %v95_v35 = vld [vmem:[%s1080_s1 + $0x270] sm:$0xff] }
  0x2c   :  { %v681_v33 = vpack.c.bf16 %v94_v30, %v93_v29  ;;  %v683_v34 = vpack.c.bf16 %v112_v32, %v111_v31  ;;  %v96_v36 = vld [vmem:[%s1080_s1 + $0x278] sm:$0xff]  ;;  %v474_v39 = vld [vmem:[%s1081_s2] ss:$0 sm:$0xff]  ;;  %s729_s1 = smov [#allocation2]  }
  0x2d   :  { %666 = vmatpush3.bf16.msra.mxu0 %v665_v9  ;;  %v685_v37 = vpack.c.bf16 %v96_v36, %v95_v35  ;;  %s466_s2 = sshll.u32 %s729_s1, 4  ;;  %s467_s2 = int_to_ptr.vmem [resolvable:$true] %s466_s2 }
  0x2e   :  { %668 = vmatprep.subr.bf16.mxu0 %v667_v11  ;;  %s701_s23 = scalar_lea.vmem %s467_s2, 32  ;;  %p706_p1 = scmp.lt.s32.totalorder %s467_s2, %s467_s2 }
  0x2f   :  { %p702_p0 = scmp.ne.s32.totalorder %s467_s2, %s701_s23  ;;  %p707_p2 = scmp.lt.s32.totalorder %s701_s23, %s701_s23 }
  0x31   :  { %670 = vmatpush3.bf16.msra.mxu0 %v669_v15  ;;  %p708_p3 = por %p707_p2, %p706_p1 }
  0x32   :  { %672 = vmatprep.subr.bf16.mxu0 %v671_v16 }
  0x33   :  { %p709_p4 = pnand %p708_p3, %p702_p0 }
  0x35   :  { %674 = vmatpush3.bf16.msra.mxu0 %v673_v21 }
  0x36   :  { %676 = vmatprep.subr.bf16.mxu0 %v675_v22 }
  0x39   :  { %678 = vmatpush3.bf16.msra.mxu0 %v677_v27 }
  0x3a   :  { %680 = vmatprep.subr.bf16.mxu0 %v679_v28 }
  0x3d   :  { %682 = vmatpush3.bf16.msra.mxu0 %v681_v33 }
  0x3e   :  { %684 = vmatprep.subr.bf16.mxu0 %v683_v34 }
  0x41   :  { %686 = vmatpush3.bf16.msra.mxu0 %v685_v37 }
  0x44   :  { %371 = vmatmul.mubr.f32.vlgmr.msra.gmra.mrb[2].mxu0 %v980_v58 }
  0xf7   :  { %v508_v38 = vpop.f32.mrb[0].mxu0 }
  0xf8   :  { %v509_v40 = vpop.f32.mrb[1].mxu0 }
  0xf9   :  { %v543_v41 = vpop.f32.mrb[0].mxu1  ;;  %v510_v42 = vadd.f32 %v509_v40, %v508_v38 }
  0xfa   :  { %v544_v43 = vpop.f32.mrb[1].mxu1 }
  0xfb   :  { %v545_v44 = vadd.f32 %v544_v43, %v543_v41  ;;  %v233_v45 = vadd.f32 %v510_v42, %v474_v39 }
  0xfd   :  { %v303_v46 = vadd.f32 %v545_v44, %v233_v45  ;;  %v442_v47 = vpop.f32.mrb[2].mxu1 }
  0xfe   :  { %v590_v48 = vpop.f32.mrb[3].mxu1 }
 0x117   :  { %v578_v49 = vpop.f32.mrb[2].mxu0 }
 0x118   :  { %v579_v50 = vpop.f32.mrb[3].mxu0 }
 0x119   :  { %v580_v51 = vadd.f32 %v579_v50, %v578_v49 }
 0x11b   :  { %v373_v52 = vadd.f32 %v580_v51, %v303_v46 }
 0x11d   :  { %v443_v53 = vadd.f32 %v442_v47, %v373_v52 }
 0x11f   :  { %v447_v54 = vsel %vm446_vm2, %v443_v53, -inf }
 0x120   :  { %448 = vmax.xlane.f32.xlu0 %v447_v54 }
 0x1ad   :  { %v449_v55 = vpop.xlane.xlu0 %448 }
 0x1ae   :  { %v450_v56 = vsub.f32 %v443_v53, %v449_v55 }
 0x1b0   :  { %v451_v57 = vmul.f32 1.442695, %v450_v56 }
 0x1b2   :  { %697 = vpow2.f32 %v451_v57 }
 0x1bc   :  { %v698_v58 = vpop.eup %697 }
 0x1bd   :  { %v453_v59 = vsel %vm446_vm2, %v698_v58, 0.0 }
 0x1be   :  { %454 = vadd.xlane.f32.xlu0 %v453_v59 }
 0x24b   :  { %v455_v60 = vpop.xlane.xlu0 %454 }
 0x24c   :  { %699 = vlog2.f32 %v455_v60 }
 0x256   :  { %v700_v61 = vpop.eup %699 }
 0x257   :  { %v457_v62 = vmul.f32 0.6931472, %v700_v61 }
 0x259   :  { %v458_v63 = vsub.f32 %v450_v56, %v457_v62 }
 0x25b   :  { %459 = vst.msk [vmem:[#allocation2] sm:$0x3] %vm446_vm2, %v458_v63 }
 0x25c   :  { %712 = shalt.err (!%p709_p4)
}
 0x25d   :  { %s713_s26 = scalar_lea.hbm %s1082_s3, 32 }
 0x25e   :  { %p714_p5 = scmp.ne.s32.totalorder %s1082_s3, %s713_s26  ;;  %p717_p6 = scmp.lt.u32.totalorder %s713_s26, %s1082_s3 }
 0x260   :  { %p719_p7 = pnand %p717_p6, %p714_p5 }
 0x262   :  { %722 = shalt.err (!%p719_p7)
}
 0x263   :  { %469 = dma.vmem_to_hbm [thread:$0]  %s467_s2, 32, %s1082_s3, [#allocation3]  }
 0x264   :  { %723 = dma.done.wait [#allocation3], 32  }
 0x265   :  { %724 = vsyncadd [#allocation3], 4294967264 }
 0x266   :  { %473 = vsyncpa [#allocation3], 1 }

</bundles_post_ra>
